<compile_context>
chip_gen: v6e
topology: v6e:2x2x1
jax: 0.10.0
libtpu: 0.0.40
codegen_flags: <defaults>
</compile_context>

<pallas_src>
from functools import partial

import jax
import jax.numpy as jnp
from jax.experimental import pallas as pl
from jax.experimental.pallas import tpu as pltpu

P_LANES = 128  # lane-dense feature padding


# ---------------------------------------------------------------------------
# Fused multi-layer TGNN kernel: one grid step == one TGNNConv layer.
# ---------------------------------------------------------------------------
def tgnn_fused_kernel(x_hbm, adj_hbm,
                      wcat_ref, bcat_ref, wvt_ref, bv_ref, vec_ref,
                      out_ref, adj_vmem, sem):
    l = pl.program_id(0)
    n_layers = pl.num_programs(0)
    cdt = wcat_ref.dtype                     # compute dtype (bf16 or f32)
    P = out_ref.shape[1]

    # Layer 0: kick off the adjacency DMA into its single VMEM buffer (waited
    # only right before the aggregation matmul, so it overlaps the per-node
    # transform matmul), and DMA the padded features straight into the resident
    # output block (h0 = x).  No separate x VMEM buffer, no VMEM->VMEM copy.
    @pl.when(l == 0)
    def _():
        pltpu.make_async_copy(adj_hbm, adj_vmem, sem.at[0]).start()
        xcp = pltpu.make_async_copy(x_hbm, out_ref, sem.at[1])
        xcp.start()
        xcp.wait()

    h = out_ref[...].astype(cdt)             # [Np, P] previous activations

    # Fused per-node transforms: ONE lane-dense MXU matmul for w1 | w2 | w3.
    # (the "ones" column of w2 is folded into its bias host-side)
    y = jnp.dot(h, wcat_ref[0], preferred_element_type=jnp.float32) + bcat_ref[0]
    x_sum = y[:, 0 * P:1 * P]
    x_prod = jnp.tanh(y[:, 1 * P:2 * P])
    x_self = y[:, 2 * P:3 * P]

    # Edge aggregation as one matmul against the count adjacency:
    #   sum_agg  = A @ x_sum
    #   prod_agg = sign(parity of A @ [x<0]) * exp(A @ log|x|), zeroed where a
    #              zero factor exists; exp(0)=1 matches the "ones" init.
    absx = jnp.abs(x_prod)
    logx = jnp.log(jnp.maximum(absx, 1e-30))
    negx = (x_prod < 0.0)
    zerx = (absx == 0.0)
    stacked = jnp.concatenate(
        [x_sum.astype(cdt), logx.astype(cdt), negx.astype(cdt), zerx.astype(cdt)],
        axis=-1)                              # [Np, 4P]

    @pl.when(l == 0)
    def _():
        pltpu.make_async_copy(adj_hbm, adj_vmem, sem.at[0]).wait()

    agg = jnp.dot(adj_vmem[...], stacked, preferred_element_type=jnp.float32)
    sum_agg = agg[:, 0 * P:1 * P]
    log_agg = agg[:, 1 * P:2 * P]
    neg_cnt = agg[:, 2 * P:3 * P]
    zero_cnt = agg[:, 3 * P:4 * P]

    parity = neg_cnt - 2.0 * jnp.floor(neg_cnt * 0.5)   # counts are exact ints
    sign = 1.0 - 2.0 * parity
    prod_raw = jnp.where(zero_cnt > 0.5, 0.0, sign * jnp.exp(log_agg))

    prod_agg = (jnp.dot(prod_raw.astype(cdt), wvt_ref[0],
                        preferred_element_type=jnp.float32) + bv_ref[0])

    # Attention epilogue entirely on the VPU: no width-3 tensors, no tiny MXU
    # dot.  vec rows 0..2 = att1/att2/att3 weights, rows 3..5 = att_vec^T.
    vec = vec_ref[0]                                          # [8, P] f32
    z1 = jnp.sum(prod_agg * vec[0:1, :], axis=-1, keepdims=True)   # [Np, 1]
    z2 = jnp.sum(sum_agg * vec[1:2, :], axis=-1, keepdims=True)
    z3 = jnp.sum(x_self * vec[2:3, :], axis=-1, keepdims=True)
    s1 = jax.nn.sigmoid(z1)
    s2 = jax.nn.sigmoid(z2)
    s3 = jax.nn.sigmoid(z3)

    def avt(i, k):                    # att_vec^T[i, k] as a [1, 1] broadcastable
        return vec[3 + i:4 + i, k:k + 1]

    inv_T = 1.0 / 3.0
    q0 = (s1 * avt(0, 0) + s2 * avt(1, 0) + s3 * avt(2, 0)) * inv_T
    q1 = (s1 * avt(0, 1) + s2 * avt(1, 1) + s3 * avt(2, 1)) * inv_T
    q2 = (s1 * avt(0, 2) + s2 * avt(1, 2) + s3 * avt(2, 2)) * inv_T
    m = jnp.maximum(jnp.maximum(q0, q1), q2)
    e0 = jnp.exp(q0 - m)
    e1 = jnp.exp(q1 - m)
    e2 = jnp.exp(q2 - m)
    inv_den = 1.0 / (e0 + e1 + e2)

    rst = ((e0 * inv_den) * prod_agg
           + (e1 * inv_den) * sum_agg
           + (e2 * inv_den) * x_self)

    # ReLU between hidden layers folded into the single store; the final layer
    # returns raw logits.
    out_ref[...] = jnp.where(l < n_layers - 1, jnp.maximum(rst, 0.0), rst)


# ---------------------------------------------------------------------------
# Wrapper: pad to lane-dense layout, build adjacency, single fused pallas_call.
# ---------------------------------------------------------------------------
def _round_up(v, m):
    return ((v + m - 1) // m) * m


def _pack_layer(p, P, cdtype):
    wcat = jnp.zeros((P, 3 * P), jnp.float32)
    wcat = wcat.at[:p["w1t"].shape[0], 0 * P:0 * P + p["w1t"].shape[1]].set(p["w1t"])
    wcat = wcat.at[:p["w2t"].shape[0], 1 * P:1 * P + p["w2t"].shape[1]].set(p["w2t"])
    wcat = wcat.at[:p["w3t"].shape[0], 2 * P:2 * P + p["w3t"].shape[1]].set(p["w3t"])
    bcat = jnp.zeros((1, 3 * P), jnp.float32)
    bcat = bcat.at[:, 0 * P:0 * P + p["b1"].shape[1]].set(p["b1"])
    bcat = bcat.at[:, 1 * P:1 * P + p["b2"].shape[1]].set(p["b2"])
    bcat = bcat.at[:, 2 * P:2 * P + p["b3"].shape[1]].set(p["b3"])
    wvt = jnp.zeros((P, P), jnp.float32)
    wvt = wvt.at[:p["wvt"].shape[0], :p["wvt"].shape[1]].set(p["wvt"])
    bv = jnp.zeros((1, P), jnp.float32).at[:, :p["bv"].shape[1]].set(p["bv"])
    vec = jnp.zeros((8, P), jnp.float32)
    vec = vec.at[0, :p["a1"].shape[1]].set(p["a1"][0])
    vec = vec.at[1, :p["a2"].shape[1]].set(p["a2"][0])
    vec = vec.at[2, :p["a3"].shape[1]].set(p["a3"][0])
    vec = vec.at[3:6, :3].set(p["avecT"])
    return (wcat.astype(cdtype), bcat, wvt.astype(cdtype), bv, vec)


def pack_params(params_list, P, cdtype):
    packed = [_pack_layer(p, P, cdtype) for p in params_list]
    wcat, bcat, wvt, bv, vec = (jnp.stack(list(t)) for t in zip(*packed))
    return wcat, bcat, wvt, bv, vec


@partial(jax.jit, static_argnames=("compute_dtype",))
def tgnn_forward_pallas(x, row, col, params_list, *, compute_dtype=jnp.bfloat16):
    """Full TGNN forward (all layers) in one fused Pallas kernel."""
    N, F = x.shape
    L = len(params_list)                       # num_layers hidden convs + final
    num_classes = params_list[-1]["w1t"].shape[1]
    P = P_LANES
    assert F <= P and num_classes <= P
    Np = _round_up(max(N, 16), 16)

    x_pad = jnp.zeros((Np, P), jnp.float32).at[:N, :F].set(x.astype(jnp.float32))
    # Dense count adjacency A[target, source] built with safe host-side scatter
    # (duplicate edges become counts; bad indices never reach the kernel).
    # bf16 counts are exact up to 256 duplicates of the same (src, dst) pair.
    adj = (jnp.zeros((Np, Np), jnp.float32).at[col, row].add(1.0)
           .astype(compute_dtype))

    wcat, bcat, wvt, bv, vec = pack_params(params_list, P, compute_dtype)

    mat3_spec = pl.BlockSpec((1, P, 3 * P), lambda l: (l, 0, 0))
    row3_spec = pl.BlockSpec((1, 1, 3 * P), lambda l: (l, 0, 0))
    mat_spec = pl.BlockSpec((1, P, P), lambda l: (l, 0, 0))
    rowp_spec = pl.BlockSpec((1, 1, P), lambda l: (l, 0, 0))
    vec_spec = pl.BlockSpec((1, 8, P), lambda l: (l, 0, 0))
    any_spec = pl.BlockSpec(memory_space=pl.ANY)          # raw HBM, manual DMA

    grid_spec = pltpu.PrefetchScalarGridSpec(
        num_scalar_prefetch=0,
        grid=(L,),
        in_specs=[any_spec, any_spec,                     # x, adj
                  mat3_spec, row3_spec,                   # wcat, bcat
                  mat_spec, rowp_spec,                    # wvt, bv
                  vec_spec],                              # att vectors / att_vec
        out_specs=pl.BlockSpec((Np, P), lambda l: (0, 0)),  # resident hidden state
        scratch_shapes=[pltpu.VMEM((Np, Np), compute_dtype),   # single-buffered adj
                        pltpu.SemaphoreType.DMA((2,))],
    )

    # Explicit VMEM budget sized from the actual buffers (per-generation notes:
    # keep below ~120 MiB on v5e/v6e, ~60 MiB on v7x; tiny here).
    csize = jnp.dtype(compute_dtype).itemsize
    need = (Np * Np * csize                        # adjacency scratch (x1)
            + 2 * (P * 3 * P + P * P) * csize      # double-buffered weights
            + 2 * (3 * P + P + 8 * P) * 4          # double-buffered bias/att rows
            + 2 * Np * P * 4                       # resident output block
            + Np * 4 * P * (4 + csize)             # stacked + agg temporaries
            + 6 * Np * P * 4)                      # misc f32 temporaries
    vmem_limit = int(min(max(need * 3 // 2, 32 * 2 ** 20), 100 * 2 ** 20))

    flops = L * (2 * Np * P * 3 * P          # fused w1|w2|w3 matmul
                 + 2 * Np * P * P            # v matmul
                 + 2 * Np * Np * 4 * P       # adjacency aggregation matmul
                 + 30 * Np * P)              # epilogue elementwise
    transcendentals = L * Np * (3 * P + 8)
    bytes_accessed = (x_pad.size * 4 + adj.size * csize
                      + (wcat.size + wvt.size) * csize
                      + (bcat.size + bv.size + vec.size) * 4 + Np * P * 4)

    out = pl.pallas_call(
        tgnn_fused_kernel,
        out_shape=jax.ShapeDtypeStruct((Np, P), jnp.float32),
        grid_spec=grid_spec,
        compiler_params=pltpu.CompilerParams(
            dimension_semantics=("arbitrary",),       # layer axis carries state
            vmem_limit_bytes=vmem_limit),
        cost_estimate=pl.CostEstimate(flops=int(flops),
                                      transcendentals=int(transcendentals),
                                      bytes_accessed=int(bytes_accessed)),
        input_output_aliases={0: 0},                  # donate x buffer -> output
    )(x_pad, adj, wcat, bcat, wvt, bv, vec)
    return out[:N, :num_classes]


# ---------------------------------------------------------------------------
# Parameter construction (deterministic, torch.nn.Linear-like uniform init)
# ---------------------------------------------------------------------------
def _linear(key, fan_in, fan_out, bias=True):
    bound = 1.0 / (fan_in ** 0.5)
    kw, kb = jax.random.split(key)
    w = jax.random.uniform(kw, (fan_out, fan_in), jnp.float32, -bound, bound)
    b = (jax.random.uniform(kb, (fan_out,), jnp.float32, -bound, bound)
         if bias else None)
    return w, b


def make_conv_params(key, emb_dim, hidden_dim, rank_dim):
    ks = jax.random.split(key, 8)
    W1, b1 = _linear(ks[0], emb_dim, hidden_dim)
    W2, b2 = _linear(ks[1], emb_dim + 1, rank_dim)
    W3, b3 = _linear(ks[2], emb_dim, hidden_dim)
    Wv, bv = _linear(ks[3], rank_dim, hidden_dim)
    A1, _ = _linear(ks[4], hidden_dim, 1, bias=False)
    A2, _ = _linear(ks[5], hidden_dim, 1, bias=False)
    A3, _ = _linear(ks[6], hidden_dim, 1, bias=False)
    Avec, _ = _linear(ks[7], 3, 3, bias=False)
    return {
        "w1t": W1.T, "b1": b1[None, :],
        # w2(cat(x, 1)) == x @ W2[:, :emb].T + (W2[:, emb] + b2)
        "w2t": W2[:, :emb_dim].T, "b2": (b2 + W2[:, emb_dim])[None, :],
        "w3t": W3.T, "b3": b3[None, :],
        "wvt": Wv.T, "bv": bv[None, :],
        "a1": A1, "a2": A2, "a3": A3,      # each [1, hidden_dim]
        "avecT": Avec.T,                   # [3, 3]
    }


def make_tgnn_params(key, num_layers, in_dim, num_hidden, num_classes):
    keys = jax.random.split(key, num_layers + 1)
    params = [make_conv_params(keys[0], in_dim, num_hidden, num_hidden)]
    for l in range(1, num_layers):
        params.append(make_conv_params(keys[l], num_hidden, num_hidden, num_hidden))
    params.append(make_conv_params(keys[num_layers], num_hidden, num_classes, num_hidden))
    return params


# ---------------------------------------------------------------------------
# Pure-JAX reference (for correctness check of the Pallas kernel)
# ---------------------------------------------------------------------------
def conv_ref(x, row, col, p, apply_relu):
    N = x.shape[0]
    x_sum = x @ p["w1t"] + p["b1"]
    x_prod = jnp.tanh(x @ p["w2t"] + p["b2"])
    x_self = x @ p["w3t"] + p["b3"]
    sum_agg = jax.ops.segment_sum(x_sum[row], col, num_segments=N)
    prod_agg = jax.ops.segment_prod(x_prod[row], col, num_segments=N)
    prod_agg = prod_agg @ p["wvt"] + p["bv"]
    z = jnp.concatenate([
        jnp.sum(prod_agg * p["a1"], -1, keepdims=True),
        jnp.sum(sum_agg * p["a2"], -1, keepdims=True),
        jnp.sum(x_self * p["a3"], -1, keepdims=True)], -1)
    a = jax.nn.softmax(jax.nn.sigmoid(z) @ p["avecT"] / 3.0, axis=-1)
    rst = a[:, 0:1] * prod_agg + a[:, 1:2] * sum_agg + a[:, 2:3] * x_self
    return jnp.maximum(rst, 0.0) if apply_relu else rst


def tgnn_ref(x, row, col, params, num_layers):
    h = x
    for l in range(num_layers):
        h = conv_ref(h, row, col, params[l], apply_relu=True)
    return conv_ref(h, row, col, params[-1], apply_relu=False)


if __name__ == "__main__":
    # Small synthetic graph: N nodes, E directed edges.
    num_layers, in_dim, num_hidden, num_classes = 2, 8, 16, 4
    N, E = 16, 32

    key = jax.random.PRNGKey(0)
    kx, krow, kcol, kp = jax.random.split(key, 4)

    x = jax.random.normal(kx, (N, in_dim), jnp.float32)
    row = jax.random.randint(krow, (E,), 0, N, jnp.int32)
    col = jax.random.randint(kcol, (E,), 0, N, jnp.int32)
    # torch's scatter sizes the output to max(col)+1; require it to equal N.
    col = col.at[-1].set(N - 1)

    params = make_tgnn_params(kp, num_layers, in_dim, num_hidden, num_classes)
    ref = tgnn_ref(x, row, col, params, num_layers)

    # Strict semantics check: f32 compute path must match the reference closely.
    out_f32 = jax.block_until_ready(
        tgnn_forward_pallas(x, row, col, params, compute_dtype=jnp.float32))
    assert out_f32.shape == (N, num_classes)
    err32 = float(jnp.max(jnp.abs(out_f32 - ref)))
    assert jnp.allclose(out_f32, ref, atol=1e-3, rtol=1e-3), (
        f"f32 mismatch vs JAX reference (max abs err {err32})")

    # Fast path: bf16 MXU operands (per perf review), f32 accumulation.
    # Looser sanity bound: bf16 operand rounding only; semantics verified above.
    out_bf16 = jax.block_until_ready(
        tgnn_forward_pallas(x, row, col, params, compute_dtype=jnp.bfloat16))
    rel = float(jnp.linalg.norm(out_bf16 - ref) / (jnp.linalg.norm(ref) + 1e-12))
    assert rel < 5e-2, f"bf16 mode drifted too far from reference (rel err {rel})"

    print("KERNEL_OK")
</pallas_src>

<mosaic_0001>
module attributes {stable_mosaic.version = 11 : i64} {
  func.func private @main(%arg0: i32) attributes {dimension_semantics = [#tpu.dimension_semantics<core_parallel>], iteration_bounds = array<i64: 2>, tpu.core_type = #tpu.core_type<sc_scalar_subcore>, window_params = []} {
    return
  }
}

module attributes {stable_mosaic.version = 11 : i64} {
  func.func private @main(%arg0: i32) attributes {dimension_semantics = [#tpu.dimension_semantics<core_parallel>], iteration_bounds = array<i64: 2>, tpu.core_type = #tpu.core_type<sc_scalar_subcore>, window_params = []} {
    return
  }
}

module attributes {stable_mosaic.version = 11 : i64} {
  func.func @tgnn_fused_kernel(%arg0: i32, %arg1: memref<16x128xf32, #tpu.memory_space<any>>, %arg2: memref<16x16xf32, #tpu.memory_space<any>>, %arg3: memref<1x128x384xf32, #tpu.memory_space<vmem>>, %arg4: memref<1x1x384xf32, #tpu.memory_space<vmem>>, %arg5: memref<1x128x128xf32, #tpu.memory_space<vmem>>, %arg6: memref<1x1x128xf32, #tpu.memory_space<vmem>>, %arg7: memref<1x8x128xf32, #tpu.memory_space<vmem>>, %arg8: memref<16x128xf32, #tpu.memory_space<vmem>>, %arg9: memref<16x16xf32, #tpu.memory_space<vmem>>, %arg10: memref<2x!tpu.dma_semaphore, #tpu.memory_space<semaphore_mem>>) attributes {dimension_semantics = [#tpu.dimension_semantics<arbitrary>], iteration_bounds = array<i64: 3>, scalar_prefetch = 0 : i64, scratch_operands = 2 : i64, tpu.core_type = #tpu.core_type<tc>, window_params = [{}, {}, {transform_indices = @transform_2, window_bounds = array<i64: 1, 128, 384>}, {transform_indices = @transform_3, window_bounds = array<i64: 1, 1, 384>}, {transform_indices = @transform_4, window_bounds = array<i64: 1, 128, 128>}, {transform_indices = @transform_5, window_bounds = array<i64: 1, 1, 128>}, {transform_indices = @transform_6, window_bounds = array<i64: 1, 8, 128>}, {pipeline_mode = #tpu.pipeline_mode<synchronous>, transform_indices = @transform_7, window_bounds = array<i64: 16, 128>}]} {
    %c0_i32 = arith.constant 0 : i32
    %0 = arith.cmpi eq, %arg0, %c0_i32 : i32
    %1 = arith.extui %0 : i1 to i32
    %c0_i32_0 = arith.constant 0 : i32
    %2 = arith.cmpi ne, %1, %c0_i32_0 : i32
    scf.if %2 {
      %c0_i32_45 = arith.constant 0 : i32
      %159 = tpu.memref_slice %arg10[%c0_i32_45] : memref<2x!tpu.dma_semaphore, #tpu.memory_space<semaphore_mem>> -> memref<1x!tpu.dma_semaphore, #tpu.memory_space<semaphore_mem>>
      %160 = tpu.memref_squeeze %159 : memref<1x!tpu.dma_semaphore, #tpu.memory_space<semaphore_mem>> -> memref<!tpu.dma_semaphore, #tpu.memory_space<semaphore_mem>>
      tpu.enqueue_dma source(%arg2 : memref<16x16xf32, #tpu.memory_space<any>>) target(%arg9 : memref<16x16xf32, #tpu.memory_space<vmem>>) target_semaphore(%160 : memref<!tpu.dma_semaphore, #tpu.memory_space<semaphore_mem>>)
      %c1_i32 = arith.constant 1 : i32
      %161 = tpu.memref_slice %arg10[%c1_i32] : memref<2x!tpu.dma_semaphore, #tpu.memory_space<semaphore_mem>> -> memref<1x!tpu.dma_semaphore, #tpu.memory_space<semaphore_mem>>
      %162 = tpu.memref_squeeze %161 : memref<1x!tpu.dma_semaphore, #tpu.memory_space<semaphore_mem>> -> memref<!tpu.dma_semaphore, #tpu.memory_space<semaphore_mem>>
      tpu.enqueue_dma source(%arg1 : memref<16x128xf32, #tpu.memory_space<any>>) target(%arg8 : memref<16x128xf32, #tpu.memory_space<vmem>>) target_semaphore(%162 : memref<!tpu.dma_semaphore, #tpu.memory_space<semaphore_mem>>)
      %c1_i32_46 = arith.constant 1 : i32
      %163 = tpu.memref_slice %arg10[%c1_i32_46] : memref<2x!tpu.dma_semaphore, #tpu.memory_space<semaphore_mem>> -> memref<1x!tpu.dma_semaphore, #tpu.memory_space<semaphore_mem>>
      %164 = tpu.memref_squeeze %163 : memref<1x!tpu.dma_semaphore, #tpu.memory_space<semaphore_mem>> -> memref<!tpu.dma_semaphore, #tpu.memory_space<semaphore_mem>>
      tpu.wait_dma2 semaphore(%164 : memref<!tpu.dma_semaphore, #tpu.memory_space<semaphore_mem>>) src(%arg1 : memref<16x128xf32, #tpu.memory_space<any>>) dst(%arg8 : memref<16x128xf32, #tpu.memory_space<vmem>>)
    } else {
    }
    %c0 = arith.constant 0 : index
    %c0_1 = arith.constant 0 : index
    %3 = vector.load %arg8[%c0, %c0_1] : memref<16x128xf32, #tpu.memory_space<vmem>>, vector<16x128xf32>
    %c0_2 = arith.constant 0 : index
    %c0_3 = arith.constant 0 : index
    %c0_4 = arith.constant 0 : index
    %4 = vector.load %arg3[%c0_2, %c0_3, %c0_4] : memref<1x128x384xf32, #tpu.memory_space<vmem>>, vector<1x128x384xf32>
    %5 = vector.shape_cast %4 : vector<1x128x384xf32> to vector<128x384xf32>
    %cst = arith.constant dense<0.000000e+00> : vector<16x384xf32>
    %6 = tpu.matmul %3, %5, %cst {dimension_numbers = #tpu.dot_dimension_numbers<[1], [0], [0], [1], [0, 0, 1, 1], [], []>} : vector<16x128xf32>, vector<128x384xf32>, vector<16x384xf32> -> vector<16x384xf32>
    %c0_5 = arith.constant 0 : index
    %c0_6 = arith.constant 0 : index
    %c0_7 = arith.constant 0 : index
    %7 = vector.load %arg4[%c0_5, %c0_6, %c0_7] : memref<1x1x384xf32, #tpu.memory_space<vmem>>, vector<1x1x384xf32>
    %8 = vector.shape_cast %7 : vector<1x1x384xf32> to vector<1x384xf32>
    %9 = vector.broadcast %8 : vector<1x384xf32> to vector<16x384xf32>
    %10 = arith.addf %6, %9 : vector<16x384xf32>
    %11 = vector.extract_strided_slice %10 {offsets = [0, 0], sizes = [16, 128], strides = [1, 1]} : vector<16x384xf32> to vector<16x128xf32>
    %12 = vector.extract_strided_slice %10 {offsets = [0, 128], sizes = [16, 128], strides = [1, 1]} : vector<16x384xf32> to vector<16x128xf32>
    %13 = math.tanh %12 : vector<16x128xf32>
    %14 = vector.extract_strided_slice %10 {offsets = [0, 256], sizes = [16, 128], strides = [1, 1]} : vector<16x384xf32> to vector<16x128xf32>
    %15 = math.absf %13 : vector<16x128xf32>
    %cst_8 = arith.constant 1.000000e-30 : f32
    %16 = vector.broadcast %cst_8 : f32 to vector<16x128xf32>
    %17 = arith.maximumf %15, %16 : vector<16x128xf32>
    %18 = math.log %17 : vector<16x128xf32>
    %cst_9 = arith.constant 0.000000e+00 : f32
    %19 = vector.broadcast %cst_9 : f32 to vector<16x128xf32>
    %20 = arith.cmpf olt, %13, %19 : vector<16x128xf32>
    %cst_10 = arith.constant 0.000000e+00 : f32
    %21 = vector.broadcast %cst_10 : f32 to vector<16x128xf32>
    %22 = arith.cmpf oeq, %15, %21 : vector<16x128xf32>
    %23 = arith.extui %20 : vector<16x128xi1> to vector<16x128xi32>
    %24 = arith.sitofp %23 : vector<16x128xi32> to vector<16x128xf32>
    %25 = arith.extui %22 : vector<16x128xi1> to vector<16x128xi32>
    %26 = arith.sitofp %25 : vector<16x128xi32> to vector<16x128xf32>
    %27 = tpu.concatenate %11, %18, %24, %26 in 1 : vector<16x128xf32>, vector<16x128xf32>, vector<16x128xf32>, vector<16x128xf32> -> vector<16x512xf32>
    %c0_i32_11 = arith.constant 0 : i32
    %28 = arith.cmpi eq, %arg0, %c0_i32_11 : i32
    %29 = arith.extui %28 : i1 to i32
    %c0_i32_12 = arith.constant 0 : i32
    %30 = arith.cmpi ne, %29, %c0_i32_12 : i32
    scf.if %30 {
      %c0_i32_45 = arith.constant 0 : i32
      %159 = tpu.memref_slice %arg10[%c0_i32_45] : memref<2x!tpu.dma_semaphore, #tpu.memory_space<semaphore_mem>> -> memref<1x!tpu.dma_semaphore, #tpu.memory_space<semaphore_mem>>
      %160 = tpu.memref_squeeze %159 : memref<1x!tpu.dma_semaphore, #tpu.memory_space<semaphore_mem>> -> memref<!tpu.dma_semaphore, #tpu.memory_space<semaphore_mem>>
      tpu.wait_dma2 semaphore(%160 : memref<!tpu.dma_semaphore, #tpu.memory_space<semaphore_mem>>) src(%arg2 : memref<16x16xf32, #tpu.memory_space<any>>) dst(%arg9 : memref<16x16xf32, #tpu.memory_space<vmem>>)
    } else {
    }
    %c0_13 = arith.constant 0 : index
    %c0_14 = arith.constant 0 : index
    %31 = vector.load %arg9[%c0_13, %c0_14] : memref<16x16xf32, #tpu.memory_space<vmem>>, vector<16x16xf32>
    %cst_15 = arith.constant dense<0.000000e+00> : vector<16x512xf32>
    %32 = tpu.matmul %31, %27, %cst_15 {dimension_numbers = #tpu.dot_dimension_numbers<[1], [0], [0], [1], [0, 0, 1, 1], [], []>} : vector<16x16xf32>, vector<16x512xf32>, vector<16x512xf32> -> vector<16x512xf32>
    %33 = vector.extract_strided_slice %32 {offsets = [0, 0], sizes = [16, 128], strides = [1, 1]} : vector<16x512xf32> to vector<16x128xf32>
    %34 = vector.extract_strided_slice %32 {offsets = [0, 128], sizes = [16, 128], strides = [1, 1]} : vector<16x512xf32> to vector<16x128xf32>
    %35 = vector.extract_strided_slice %32 {offsets = [0, 256], sizes = [16, 128], strides = [1, 1]} : vector<16x512xf32> to vector<16x128xf32>
    %36 = vector.extract_strided_slice %32 {offsets = [0, 384], sizes = [16, 128], strides = [1, 1]} : vector<16x512xf32> to vector<16x128xf32>
    %cst_16 = arith.constant 5.000000e-01 : f32
    %37 = vector.broadcast %cst_16 : f32 to vector<16x128xf32>
    %38 = arith.mulf %35, %37 : vector<16x128xf32>
    %39 = math.floor %38 : vector<16x128xf32>
    %cst_17 = arith.constant 2.000000e+00 : f32
    %40 = vector.broadcast %cst_17 : f32 to vector<16x128xf32>
    %41 = arith.mulf %40, %39 : vector<16x128xf32>
    %42 = arith.subf %35, %41 : vector<16x128xf32>
    %cst_18 = arith.constant 2.000000e+00 : f32
    %43 = vector.broadcast %cst_18 : f32 to vector<16x128xf32>
    %44 = arith.mulf %43, %42 : vector<16x128xf32>
    %cst_19 = arith.constant 1.000000e+00 : f32
    %45 = vector.broadcast %cst_19 : f32 to vector<16x128xf32>
    %46 = arith.subf %45, %44 : vector<16x128xf32>
    %cst_20 = arith.constant 5.000000e-01 : f32
    %47 = vector.broadcast %cst_20 : f32 to vector<16x128xf32>
    %48 = arith.cmpf ogt, %36, %47 : vector<16x128xf32>
    %49 = math.exp %34 : vector<16x128xf32>
    %50 = arith.mulf %46, %49 : vector<16x128xf32>
    %cst_21 = arith.constant 0.000000e+00 : f32
    %51 = vector.broadcast %cst_21 : f32 to vector<16x128xf32>
    %52 = arith.select %48, %51, %50 : vector<16x128xi1>, vector<16x128xf32>
    %c0_22 = arith.constant 0 : index
    %c0_23 = arith.constant 0 : index
    %c0_24 = arith.constant 0 : index
    %53 = vector.load %arg5[%c0_22, %c0_23, %c0_24] : memref<1x128x128xf32, #tpu.memory_space<vmem>>, vector<1x128x128xf32>
    %54 = vector.shape_cast %53 : vector<1x128x128xf32> to vector<128x128xf32>
    %cst_25 = arith.constant dense<0.000000e+00> : vector<16x128xf32>
    %55 = tpu.matmul %52, %54, %cst_25 {dimension_numbers = #tpu.dot_dimension_numbers<[1], [0], [0], [1], [0, 0, 1, 1], [], []>} : vector<16x128xf32>, vector<128x128xf32>, vector<16x128xf32> -> vector<16x128xf32>
    %c0_26 = arith.constant 0 : index
    %c0_27 = arith.constant 0 : index
    %c0_28 = arith.constant 0 : index
    %56 = vector.load %arg6[%c0_26, %c0_27, %c0_28] : memref<1x1x128xf32, #tpu.memory_space<vmem>>, vector<1x1x128xf32>
    %57 = vector.shape_cast %56 : vector<1x1x128xf32> to vector<1x128xf32>
    %58 = vector.broadcast %57 : vector<1x128xf32> to vector<16x128xf32>
    %59 = arith.addf %55, %58 : vector<16x128xf32>
    %c0_29 = arith.constant 0 : index
    %c0_30 = arith.constant 0 : index
    %c0_31 = arith.constant 0 : index
    %60 = vector.load %arg7[%c0_29, %c0_30, %c0_31] : memref<1x8x128xf32, #tpu.memory_space<vmem>>, vector<1x8x128xf32>
    %61 = vector.shape_cast %60 : vector<1x8x128xf32> to vector<8x128xf32>
    %62 = vector.extract_strided_slice %61 {offsets = [0, 0], sizes = [1, 128], strides = [1, 1]} : vector<8x128xf32> to vector<1x128xf32>
    %63 = vector.broadcast %62 : vector<1x128xf32> to vector<16x128xf32>
    %64 = arith.mulf %59, %63 : vector<16x128xf32>
    %cst_32 = arith.constant dense<0.000000e+00> : vector<16xf32>
    %65 = vector.multi_reduction <add>, %64, %cst_32 [1] : vector<16x128xf32> to vector<16xf32>
    %66 = vector.shape_cast %65 : vector<16xf32> to vector<16x1xf32>
    %67 = vector.extract_strided_slice %61 {offsets = [1, 0], sizes = [1, 128], strides = [1, 1]} : vector<8x128xf32> to vector<1x128xf32>
    %68 = vector.broadcast %67 : vector<1x128xf32> to vector<16x128xf32>
    %69 = arith.mulf %33, %68 : vector<16x128xf32>
    %cst_33 = arith.constant dense<0.000000e+00> : vector<16xf32>
    %70 = vector.multi_reduction <add>, %69, %cst_33 [1] : vector<16x128xf32> to vector<16xf32>
    %71 = vector.shape_cast %70 : vector<16xf32> to vector<16x1xf32>
    %72 = vector.extract_strided_slice %61 {offsets = [2, 0], sizes = [1, 128], strides = [1, 1]} : vector<8x128xf32> to vector<1x128xf32>
    %73 = vector.broadcast %72 : vector<1x128xf32> to vector<16x128xf32>
    %74 = arith.mulf %14, %73 : vector<16x128xf32>
    %cst_34 = arith.constant dense<0.000000e+00> : vector<16xf32>
    %75 = vector.multi_reduction <add>, %74, %cst_34 [1] : vector<16x128xf32> to vector<16xf32>
    %76 = vector.shape_cast %75 : vector<16xf32> to vector<16x1xf32>
    %77 = arith.negf %66 : vector<16x1xf32>
    %78 = math.exp %77 : vector<16x1xf32>
    %cst_35 = arith.constant 1.000000e+00 : f32
    %79 = vector.broadcast %cst_35 : f32 to vector<16x1xf32>
    %80 = arith.addf %79, %78 : vector<16x1xf32>
    %81 = arith.divf %79, %80 : vector<16x1xf32>
    %82 = arith.negf %71 : vector<16x1xf32>
    %83 = math.exp %82 : vector<16x1xf32>
    %cst_36 = arith.constant 1.000000e+00 : f32
    %84 = vector.broadcast %cst_36 : f32 to vector<16x1xf32>
    %85 = arith.addf %84, %83 : vector<16x1xf32>
    %86 = arith.divf %84, %85 : vector<16x1xf32>
    %87 = arith.negf %76 : vector<16x1xf32>
    %88 = math.exp %87 : vector<16x1xf32>
    %cst_37 = arith.constant 1.000000e+00 : f32
    %89 = vector.broadcast %cst_37 : f32 to vector<16x1xf32>
    %90 = arith.addf %89, %88 : vector<16x1xf32>
    %91 = arith.divf %89, %90 : vector<16x1xf32>
    %92 = vector.extract_strided_slice %61 {offsets = [3, 0], sizes = [1, 1], strides = [1, 1]} : vector<8x128xf32> to vector<1x1xf32>
    %93 = vector.broadcast %92 : vector<1x1xf32> to vector<16x1xf32>
    %94 = arith.mulf %81, %93 : vector<16x1xf32>
    %95 = vector.extract_strided_slice %61 {offsets = [4, 0], sizes = [1, 1], strides = [1, 1]} : vector<8x128xf32> to vector<1x1xf32>
    %96 = vector.broadcast %95 : vector<1x1xf32> to vector<16x1xf32>
    %97 = arith.mulf %86, %96 : vector<16x1xf32>
    %98 = arith.addf %94, %97 : vector<16x1xf32>
    %99 = vector.extract_strided_slice %61 {offsets = [5, 0], sizes = [1, 1], strides = [1, 1]} : vector<8x128xf32> to vector<1x1xf32>
    %100 = vector.broadcast %99 : vector<1x1xf32> to vector<16x1xf32>
    %101 = arith.mulf %91, %100 : vector<16x1xf32>
    %102 = arith.addf %98, %101 : vector<16x1xf32>
    %cst_38 = arith.constant 0.333333343 : f32
    %103 = vector.broadcast %cst_38 : f32 to vector<16x1xf32>
    %104 = arith.mulf %102, %103 : vector<16x1xf32>
    %105 = vector.extract_strided_slice %61 {offsets = [3, 1], sizes = [1, 1], strides = [1, 1]} : vector<8x128xf32> to vector<1x1xf32>
    %106 = vector.broadcast %105 : vector<1x1xf32> to vector<16x1xf32>
    %107 = arith.mulf %81, %106 : vector<16x1xf32>
    %108 = vector.extract_strided_slice %61 {offsets = [4, 1], sizes = [1, 1], strides = [1, 1]} : vector<8x128xf32> to vector<1x1xf32>
    %109 = vector.broadcast %108 : vector<1x1xf32> to vector<16x1xf32>
    %110 = arith.mulf %86, %109 : vector<16x1xf32>
    %111 = arith.addf %107, %110 : vector<16x1xf32>
    %112 = vector.extract_strided_slice %61 {offsets = [5, 1], sizes = [1, 1], strides = [1, 1]} : vector<8x128xf32> to vector<1x1xf32>
    %113 = vector.broadcast %112 : vector<1x1xf32> to vector<16x1xf32>
    %114 = arith.mulf %91, %113 : vector<16x1xf32>
    %115 = arith.addf %111, %114 : vector<16x1xf32>
    %cst_39 = arith.constant 0.333333343 : f32
    %116 = vector.broadcast %cst_39 : f32 to vector<16x1xf32>
    %117 = arith.mulf %115, %116 : vector<16x1xf32>
    %118 = vector.extract_strided_slice %61 {offsets = [3, 2], sizes = [1, 1], strides = [1, 1]} : vector<8x128xf32> to vector<1x1xf32>
    %119 = vector.broadcast %118 : vector<1x1xf32> to vector<16x1xf32>
    %120 = arith.mulf %81, %119 : vector<16x1xf32>
    %121 = vector.extract_strided_slice %61 {offsets = [4, 2], sizes = [1, 1], strides = [1, 1]} : vector<8x128xf32> to vector<1x1xf32>
    %122 = vector.broadcast %121 : vector<1x1xf32> to vector<16x1xf32>
    %123 = arith.mulf %86, %122 : vector<16x1xf32>
    %124 = arith.addf %120, %123 : vector<16x1xf32>
    %125 = vector.extract_strided_slice %61 {offsets = [5, 2], sizes = [1, 1], strides = [1, 1]} : vector<8x128xf32> to vector<1x1xf32>
    %126 = vector.broadcast %125 : vector<1x1xf32> to vector<16x1xf32>
    %127 = arith.mulf %91, %126 : vector<16x1xf32>
    %128 = arith.addf %124, %127 : vector<16x1xf32>
    %cst_40 = arith.constant 0.333333343 : f32
    %129 = vector.broadcast %cst_40 : f32 to vector<16x1xf32>
    %130 = arith.mulf %128, %129 : vector<16x1xf32>
    %131 = arith.maximumf %104, %117 : vector<16x1xf32>
    %132 = arith.maximumf %131, %130 : vector<16x1xf32>
    %133 = arith.subf %104, %132 : vector<16x1xf32>
    %134 = math.exp %133 : vector<16x1xf32>
    %135 = arith.subf %117, %132 : vector<16x1xf32>
    %136 = math.exp %135 : vector<16x1xf32>
    %137 = arith.subf %130, %132 : vector<16x1xf32>
    %138 = math.exp %137 : vector<16x1xf32>
    %139 = arith.addf %134, %136 : vector<16x1xf32>
    %140 = arith.addf %139, %138 : vector<16x1xf32>
    %cst_41 = arith.constant 1.000000e+00 : f32
    %141 = vector.broadcast %cst_41 : f32 to vector<16x1xf32>
    %142 = arith.divf %141, %140 : vector<16x1xf32>
    %143 = arith.mulf %134, %142 : vector<16x1xf32>
    %144 = vector.broadcast %143 : vector<16x1xf32> to vector<16x128xf32>
    %145 = arith.mulf %144, %59 : vector<16x128xf32>
    %146 = arith.mulf %136, %142 : vector<16x1xf32>
    %147 = vector.broadcast %146 : vector<16x1xf32> to vector<16x128xf32>
    %148 = arith.mulf %147, %33 : vector<16x128xf32>
    %149 = arith.addf %145, %148 : vector<16x128xf32>
    %150 = arith.mulf %138, %142 : vector<16x1xf32>
    %151 = vector.broadcast %150 : vector<16x1xf32> to vector<16x128xf32>
    %152 = arith.mulf %151, %14 : vector<16x128xf32>
    %153 = arith.addf %149, %152 : vector<16x128xf32>
    %c2_i32 = arith.constant 2 : i32
    %154 = arith.cmpi slt, %arg0, %c2_i32 : i32
    %cst_42 = arith.constant 0.000000e+00 : f32
    %155 = vector.broadcast %cst_42 : f32 to vector<16x128xf32>
    %156 = arith.maximumf %153, %155 : vector<16x128xf32>
    %157 = arith.select %154, %156, %153 : vector<16x128xf32>
    %c0_43 = arith.constant 0 : index
    %c0_44 = arith.constant 0 : index
    %158 = vector.load %arg8[%c0_43, %c0_44] : memref<16x128xf32, #tpu.memory_space<vmem>>, vector<16x128xf32>
    tpu.vector_store %arg8[%c0_43, %c0_44], %157 {strides = array<i32>} : memref<16x128xf32, #tpu.memory_space<vmem>>, vector<16x128xf32>,
    return
  }
  func.func @transform_2(%arg0: i32) -> (i32, i32, i32) {
    %c0_i32 = arith.constant 0 : i32
    %c0_i32_0 = arith.constant 0 : i32
    %c0_i32_1 = arith.constant 0 : i32
    return %arg0, %c0_i32, %c0_i32_0 : i32, i32, i32
  }
  func.func @transform_3(%arg0: i32) -> (i32, i32, i32) {
    %c0_i32 = arith.constant 0 : i32
    %c0_i32_0 = arith.constant 0 : i32
    %c0_i32_1 = arith.constant 0 : i32
    return %arg0, %c0_i32, %c0_i32_0 : i32, i32, i32
  }
  func.func @transform_4(%arg0: i32) -> (i32, i32, i32) {
    %c0_i32 = arith.constant 0 : i32
    %c0_i32_0 = arith.constant 0 : i32
    %c0_i32_1 = arith.constant 0 : i32
    return %arg0, %c0_i32, %c0_i32_0 : i32, i32, i32
  }
  func.func @transform_5(%arg0: i32) -> (i32, i32, i32) {
    %c0_i32 = arith.constant 0 : i32
    %c0_i32_0 = arith.constant 0 : i32
    %c0_i32_1 = arith.constant 0 : i32
    return %arg0, %c0_i32, %c0_i32_0 : i32, i32, i32
  }
  func.func @transform_6(%arg0: i32) -> (i32, i32, i32) {
    %c0_i32 = arith.constant 0 : i32
    %c0_i32_0 = arith.constant 0 : i32
    %c0_i32_1 = arith.constant 0 : i32
    return %arg0, %c0_i32, %c0_i32_0 : i32, i32, i32
  }
  func.func @transform_7(%arg0: i32) -> (i32, i32) {
    %c0_i32 = arith.constant 0 : i32
    %c0_i32_0 = arith.constant 0 : i32
    %c0_i32_1 = arith.constant 0 : i32
    return %c0_i32, %c0_i32_0 : i32, i32
  }
}

</mosaic_0001>

<bundles_post_ra>
// kernel: tgnn_forward_pallas.1
= control target key start
LH: loop header
LB: loop body
LE: loop exit
PB: predicated region body
PF: predicated region fallthrough
CT: control target
= control target key end

     0   :  { %s1512_s24 = smov 0   ;;  %s1755_s0 = inlined_call_operand.vmem [shape: f32[16,128], index: 0, kind: input, shape index: {}, may-alias: {0,7}]   ;;  %s1756_s1 = inlined_call_operand.hbm [shape: f32[16,16], index: 1, kind: input, shape index: {}]   ;;  %s1757_s2 = inlined_call_operand.vmem [shape: f32[3,128,384], index: 2, kind: input, shape index: {}]   ;;  %s1758_s3 = inlined_call_operand.vmem [shape: f32[3,1,384], index: 3, kind: input, shape index: {}]   ;;  %s1759_s4 = inlined_call_operand.vmem [shape: f32[3,128,128], index: 4, kind: input, shape index: {}]   ;;  %s1760_s5 = inlined_call_operand.vmem [shape: f32[3,1,128], index: 5, kind: input, shape index: {}]   ;;  %s1761_s6 = inlined_call_operand.vmem [shape: f32[3,8,128], index: 6, kind: input, shape index: {}]   ;;  %s1762_s7 = inlined_call_operand.vmem [shape: f32[16,128], index: 7, kind: output, shape index: {}, may-alias: {0,7}]  }
   0x1 LB: > { %s1518_s25 = sadd.s32 4294967295, %s1460_s24   ;;  %p1206_p0 = scmp.ge.s32.totalorder %s1460_s24, 1  ;;  %s1460_s24 = sphi %s1512_s24, %s17_s24  }
   0x2   : > { %p220_p1 = scmp.lt.s32.totalorder %s1460_s24, 4 }
   0x4   : > { %p221_p2 = pnand %p1206_p0, %p220_p1 }
   0x5   : > { %p259_p3 = scmp.lt.s32.totalorder (!%p221_p2), %s1518_s25, 2  ;;  %p1211_p4 = scmp.ne.s32.totalorder (!%p221_p2), %s1518_s25, 0 }
   0x6   : > { %224 = sbr.rel (%p221_p2) target bundleno = 1548 (0x60c), region = 40 }
   0xb   : > { %s1526_s26 = scalar_select %p259_p3, %s1518_s25, 2 }
   0xc   : > { %s1462_s8 = smov (!%p1211_p4), [#allocation2]  }
   0xd   : > { %s1347_s27 = smul.u32 384, %s1526_s26  ;;  %s1240_s28 = sshll.u32 %s1526_s26, 7 }
   0xe   : > { %s1348_s29 = smul.u32 3, %s1526_s26  ;;  %s1534_s9 = scalar_lea.vmem %s1759_s4, %s1240_s28 }
   0xf   : > { %s1539_s12 = scalar_lea.vmem %s1757_s2, %s1347_s27  ;;  %s275_s15 = scalar_lea.vmem %s1760_s5, %s1526_s26 }
  0x10   : > { %s1548_s18 = scalar_lea.vmem %s1758_s3, %s1348_s29  ;;  %s1210_s19 = sshll.u32 %s1526_s26, 3 }
  0x11   : > { %s1554_s22 = scalar_lea.vmem %s1761_s6, %s1210_s19  ;;  %283 = sbr.rel (%p1211_p4) target bundleno = 31 (0x1f), region = 44 }
  0x12   : > { %s291_s29 = sshll.u32 (!%p1211_p4), %s1462_s8, 4  ;;  %s292_s29 = int_to_ptr.vmem [resolvable:$true] %s291_s29 }
  0x13   : > { %s1436_s16 = scalar_lea.vmem (!%p1211_p4), %s292_s29, 256  ;;  %p1441_p6 = scmp.lt.s32.totalorder (!%p1211_p4), %s292_s29, %s292_s29 }
  0x14   : > { %p1437_p5 = scmp.ne.s32.totalorder (!%p1211_p4), %s292_s29, %s1436_s16  ;;  %p1442_p7 = scmp.lt.s32.totalorder (!%p1211_p4), %s1436_s16, %s1436_s16 }
  0x16   : > { %v329_v0 = vld [vmem:[%s1755_s0] sm:$0xff]  ;;  %v331_v1 = vld [vmem:[%s1755_s0 + $0x8] sm:$0xff]  ;;  %p1443_p8 = por %p1442_p7, %p1441_p6 }
  0x17   : > { %330 = vst [vmem:[%s1762_s7] sm:$0xff] %v329_v0  ;;  %332 = vst [vmem:[%s1762_s7 + $0x8] sm:$0xff] %v331_v1 }
  0x18   : > { %p1444_p9 = pnand %p1443_p8, %p1437_p5 }
  0x1a   : > { %1447 = shalt.err (!%p1444_p9)  }
  0x1b   : > { %294 = dma.hbm_to_vmem [thread:$0]  %s1756_s1, 256, %s292_s29, [#allocation3] }
  0x1c   : > { %340 = vsyncadd [#allocation3 + $0x1], 256 }
  0x1d   : > { %1452 = dma.done.wait [#allocation3 + $0x1], 256 }
  0x1e   : > { %1453 = vsyncadd [#allocation3 + $0x1], 4294967040 }
  0x1f PF: > { %v392_v2 = vld [vmem:[%s1539_s12 + $0x170] sm:$0xff]  ;;  %v391_v3 = vld [vmem:[%s1539_s12 + $0x168] sm:$0xff]  ;;  %v389_v4 = vld [vmem:[%s1539_s12 + $0x158] sm:$0xff]  ;;  %v1463_v6 = vmov 0.0   ;;  %p1351_p10 = scmp.eq.s32.totalorder %s1518_s25, 0  ;;  %v396_v53 = vlaneseq }
  0x20   : > { %411 = vmatprep.subr.mxu0 %v392_v2  ;;  %v388_v5 = vld [vmem:[%s1539_s12 + $0x150] sm:$0xff]  ;;  %475 = vmatprep.mubr.f32.mxu0 %v1463_v6  ;;  %v386_v7 = vld [vmem:[%s1539_s12 + $0x140] sm:$0xff]  ;;  %v385_v8 = vld [vmem:[%s1539_s12 + $0x138] sm:$0xff] }
  0x21   : > { %412 = vmatpush1.msra.mxu0 %v391_v3  ;;  %v383_v9 = vld [vmem:[%s1539_s12 + $0x128] sm:$0xff]  ;;  %v382_v10 = vld [vmem:[%s1539_s12 + $0x120] sm:$0xff]  ;;  %v380_v11 = vld [vmem:[%s1539_s12 + $0x110] sm:$0xff]  ;;  %v1633_v54 = vshrl.u32 %v396_v53, 7 }
  0x22   : > { %413 = vmatprep.subr.mxu0 %v389_v4  ;;  %v379_v12 = vld [vmem:[%s1539_s12 + $0x108] sm:$0xff]  ;;  %v377_v13 = vld [vmem:[%s1539_s12 + $0xf8] sm:$0xff]  ;;  %v376_v14 = vld [vmem:[%s1539_s12 + $0xf0] sm:$0xff] }
  0x23   : > { %414 = vmatpush1.msra.mxu0 %v388_v5  ;;  %v374_v15 = vld [vmem:[%s1539_s12 + $0xe0] sm:$0xff]  ;;  %v373_v17 = vld [vmem:[%s1539_s12 + $0xd8] sm:$0xff]  ;;  %v371_v20 = vld [vmem:[%s1539_s12 + $0xc8] sm:$0xff]  ;;  %v398_v55 = vsub.s32 0, %v1633_v54  ;;  %v402_v57 = vsub.s32 1, %v1633_v54  ;;  %v406_v1 = vsub.s32 2, %v1633_v54 }
  0x24   : > { %415 = vmatprep.subr.mxu0 %v386_v7  ;;  %v1589_v16 = vld [vmem:[%s1762_s7] sm:$0xff]  ;;  %v393_v18 = vld [vmem:[%s1539_s12 + $0x178] sm:$0xff]  ;;  %v387_v22 = vld [vmem:[%s1539_s12 + $0x148] sm:$0xff] }
  0x25   : > { %416 = vmatpush1.msra.mxu0 %v385_v8  ;;  %v390_v19 = vld [vmem:[%s1539_s12 + $0x160] sm:$0xff]  ;;  %1309 = vmatprep.mubr.f32.mxu1 %v1589_v16  ;;  %v368_v23 = vld [vmem:[%s1539_s12 + $0xb0] sm:$0xff]  ;;  %v367_v24 = vld [vmem:[%s1539_s12 + $0xa8] sm:$0xff] }
  0x26   : > { %417 = vmatprep.subr.mxu0 %v383_v9  ;;  %1277 = vmatprep.subr.mxu1 %v393_v18  ;;  %v370_v21 = vld [vmem:[%s1539_s12 + $0xc0] sm:$0xff]  ;;  %v384_v25 = vld [vmem:[%s1539_s12 + $0x130] sm:$0xff]  ;;  %v365_v26 = vld [vmem:[%s1539_s12 + $0x98] sm:$0xff] }
  0x27   : > { %418 = vmatpush1.msra.mxu0 %v382_v10  ;;  %1278 = vmatpush3.msra.mxu1 %v393_v18  ;;  %v364_v27 = vld [vmem:[%s1539_s12 + $0x90] sm:$0xff]  ;;  %v381_v28 = vld [vmem:[%s1539_s12 + $0x118] sm:$0xff]  ;;  %v362_v29 = vld [vmem:[%s1539_s12 + $0x80] sm:$0xff] }
  0x28   : > { %419 = vmatprep.subr.mxu0 %v380_v11  ;;  %1279 = vmatprep.subr.mxu1 %v390_v19  ;;  %v361_v30 = vld [vmem:[%s1539_s12 + $0x78] sm:$0xff]  ;;  %v378_v31 = vld [vmem:[%s1539_s12 + $0x100] sm:$0xff]  ;;  %v359_v32 = vld [vmem:[%s1539_s12 + $0x68] sm:$0xff] }
  0x29   : > { %420 = vmatpush1.msra.mxu0 %v379_v12  ;;  %1280 = vmatpush3.msra.mxu1 %v390_v19  ;;  %v358_v33 = vld [vmem:[%s1539_s12 + $0x60] sm:$0xff]  ;;  %v375_v34 = vld [vmem:[%s1539_s12 + $0xe8] sm:$0xff]  ;;  %v356_v35 = vld [vmem:[%s1539_s12 + $0x50] sm:$0xff] }
  0x2a   : > { %421 = vmatprep.subr.mxu0 %v377_v13  ;;  %1281 = vmatprep.subr.mxu1 %v387_v22  ;;  %v355_v36 = vld [vmem:[%s1539_s12 + $0x48] sm:$0xff]  ;;  %v372_v37 = vld [vmem:[%s1539_s12 + $0xd0] sm:$0xff]  ;;  %v353_v38 = vld [vmem:[%s1539_s12 + $0x38] sm:$0xff] }
  0x2b   : > { %422 = vmatpush1.msra.mxu0 %v376_v14  ;;  %1282 = vmatpush3.msra.mxu1 %v387_v22  ;;  %v352_v39 = vld [vmem:[%s1539_s12 + $0x30] sm:$0xff]  ;;  %v369_v40 = vld [vmem:[%s1539_s12 + $0xb8] sm:$0xff]  ;;  %v350_v41 = vld [vmem:[%s1539_s12 + $0x20] sm:$0xff] }
  0x2c   : > { %423 = vmatprep.subr.mxu0 %v374_v15  ;;  %1283 = vmatprep.subr.mxu1 %v384_v25  ;;  %v349_v42 = vld [vmem:[%s1539_s12 + $0x18] sm:$0xff]  ;;  %v366_v43 = vld [vmem:[%s1539_s12 + $0xa0] sm:$0xff]  ;;  %v347_v44 = vld [vmem:[%s1539_s12 + $0x8] sm:$0xff] }
  0x2d   : > { %424 = vmatpush1.msra.mxu0 %v373_v17  ;;  %1284 = vmatpush3.msra.mxu1 %v384_v25  ;;  %v346_v45 = vld [vmem:[%s1539_s12] sm:$0xff]  ;;  %v363_v46 = vld [vmem:[%s1539_s12 + $0x88] sm:$0xff]  ;;  %v360_v47 = vld [vmem:[%s1539_s12 + $0x70] sm:$0xff] }
  0x2e   : > { %425 = vmatprep.subr.mxu0 %v371_v20  ;;  %1285 = vmatprep.subr.mxu1 %v381_v28  ;;  %v357_v48 = vld [vmem:[%s1539_s12 + $0x58] sm:$0xff]  ;;  %v345_v49 = vld [vmem:[%s1762_s7 + $0x8] sm:$0xff]  ;;  %v354_v50 = vld [vmem:[%s1539_s12 + $0x40] sm:$0xff] }
  0x2f   : > { %426 = vmatpush1.msra.mxu0 %v370_v21  ;;  %1286 = vmatpush3.msra.mxu1 %v381_v28  ;;  %v351_v51 = vld [vmem:[%s1539_s12 + $0x28] sm:$0xff]  ;;  %v348_v52 = vld [vmem:[%s1539_s12 + $0x10] sm:$0xff]  ;;  %v394_v56 = vld [vmem:[%s1548_s18] sm:$0x7] }
  0x30   : > { %427 = vmatprep.subr.mxu0 %v368_v23  ;;  %1287 = vmatprep.subr.mxu1 %v378_v31  ;;  %v399_v58 = vrot.slane %v394_v56, %v398_v55  ;;  %v403_v59 = vrot.slane %v394_v56, %v402_v57  ;;  %v407_v5 = vrot.slane %v394_v56, %v406_v1 }
  0x31   : > { %428 = vmatpush1.msra.mxu0 %v367_v24  ;;  %1288 = vmatpush3.msra.mxu1 %v378_v31 }
  0x32   : > { %429 = vmatprep.subr.mxu0 %v365_v26  ;;  %1289 = vmatprep.subr.mxu1 %v375_v34 }
  0x33   : > { %430 = vmatpush1.msra.mxu0 %v364_v27  ;;  %1290 = vmatpush3.msra.mxu1 %v375_v34 }
  0x34   : > { %431 = vmatprep.subr.mxu0 %v362_v29  ;;  %1291 = vmatprep.subr.mxu1 %v372_v37 }
  0x35   : > { %432 = vmatpush1.msra.mxu0 %v361_v30  ;;  %1292 = vmatpush3.msra.mxu1 %v372_v37 }
  0x36   : > { %433 = vmatprep.subr.mxu0 %v359_v32  ;;  %1293 = vmatprep.subr.mxu1 %v369_v40 }
  0x37   : > { %434 = vmatpush1.msra.mxu0 %v358_v33  ;;  %1294 = vmatpush3.msra.mxu1 %v369_v40 }
  0x38   : > { %435 = vmatprep.subr.mxu0 %v356_v35  ;;  %1295 = vmatprep.subr.mxu1 %v366_v43 }
  0x39   : > { %436 = vmatpush1.msra.mxu0 %v355_v36  ;;  %1296 = vmatpush3.msra.mxu1 %v366_v43 }
  0x3a   : > { %437 = vmatprep.subr.mxu0 %v353_v38  ;;  %1297 = vmatprep.subr.mxu1 %v363_v46 }
  0x3b   : > { %438 = vmatpush1.msra.mxu0 %v352_v39  ;;  %1298 = vmatpush3.msra.mxu1 %v363_v46 }
  0x3c   : > { %439 = vmatprep.subr.mxu0 %v350_v41  ;;  %1299 = vmatprep.subr.mxu1 %v360_v47 }
  0x3d   : > { %440 = vmatpush1.msra.mxu0 %v349_v42  ;;  %1300 = vmatpush3.msra.mxu1 %v360_v47 }
  0x3e   : > { %441 = vmatprep.subr.mxu0 %v347_v44  ;;  %1301 = vmatprep.subr.mxu1 %v357_v48 }
  0x3f   : > { %442 = vmatpush1.msra.mxu0 %v346_v45  ;;  %1302 = vmatpush3.msra.mxu1 %v357_v48 }
  0x40   : > { %476 = vmatmul.mubr.f32.vlgmr.msra.gmra.mxu0 %v1589_v16  ;;  %1303 = vmatprep.subr.mxu1 %v354_v50 }
  0x41   : > { %481 = vmatprep.mubr.f32.mxu0 %v1463_v6  ;;  %1304 = vmatpush3.msra.mxu1 %v354_v50 }
  0x42   : > { %1305 = vmatprep.subr.mxu1 %v351_v51 }
  0x43   : > { %1306 = vmatpush3.msra.mxu1 %v351_v51 }
  0x44   : > { %482 = vmatmul.mubr.f32.gmra.mxu0 %v345_v49  ;;  %1307 = vmatprep.subr.mxu1 %v348_v52 }
  0x45   : > { %1308 = vmatpush3.msra.mxu1 %v348_v52 }
  0x46   : > { %1310 = vmatmul.mubr.f32.vlgmr.msra.gmra.mxu1 %v345_v49 }
 0x100   : > { %v477_v60 = vpop.f32.mrf.mxu0 }
 0x101   : > { %v478_v61 = vadd.f32 %v477_v60, %v399_v58 }
 0x102   : > { %v479_v62 = vpop.f32.mrf.mxu0 }
 0x103   : > { %v480_v63 = vadd.f32 %v479_v62, %v403_v59 }
 0x104   : > { %v483_v0 = vpop.f32.mrf.mxu0 }
 0x105   : > { %1370 = vtanh.f32 %v480_v63  ;;  %v484_v2 = vadd.f32 %v483_v0, %v399_v58 }
 0x106   : > { %v485_v3 = vpop.f32.mrf.mxu0  ;;  %v1311_v7 = vpop.f32.mrf.mxu1 }
 0x107   : > { %v486_v4 = vadd.f32 %v485_v3, %v403_v59  ;;  %v1645_v8 = vadd.f32 %v1311_v7, %v407_v5 }
 0x108   : > { %v554_v9 = vpop.f32.mrf.mxu1 }
 0x109   : > { %1372 = vtanh.f32 %v486_v4  ;;  %v1647_v10 = vadd.f32 %v554_v9, %v407_v5 }
 0x112   : > { %v1371_v11 = vpop.eup %1370 }
 0x113   : > { %v565_v12 = vand.u32 2147483647, %v1371_v11  ;;  %vm573_vm0 = vcmp.lt.f32.partialorder %v1371_v11, 0.0 }
 0x115   : > { %v567_v13 = vmax.f32 %v565_v12, 1e-30  ;;  %vm1649_vm1 = vcmp.eq.f32.partialorder %v565_v12, 0.0 }
 0x116   : > { %v1373_v15 = vpop.eup %1372 }
 0x117   : > { %1374 = vlog2.f32 %v567_v13  ;;  %v566_v16 = vand.u32 2147483647, %v1373_v15  ;;  %vm574_vm2 = vcmp.lt.f32.partialorder %v1373_v15, 0.0 }
 0x119   : > { %v568_v17 = vmax.f32 %v566_v16, 1e-30  ;;  %vm576_vm3 = vcmp.eq.f32.partialorder %v566_v16, 0.0 }
 0x11b   : > { %1376 = vlog2.f32 %v568_v17 }
 0x124   : > { %v1375_v18 = vpop.eup %1374 }
 0x125   : > { %v570_v19 = vmul.f32 0.6931472, %v1375_v18 }
 0x128   : > { %v1377_v20 = vpop.eup %1376 }
 0x129   : > { %v572_v21 = vmul.f32 0.6931472, %v1377_v20 }
 0x12a   : > { %1455 = dma.done.wait (%p1351_p10), [#allocation3], 256 }
 0x12b   : > { %1457 = vsyncadd (%p1351_p10), [#allocation3], 4294967040  ;;  %628 = vmatprep.subr.mxu0 %v572_v21  ;;  %664 = vmatprep.mubr.f32.mxu0 %v1463_v6  ;;  %v1464_v22 = vmov 1.0   ;;  %vm593_vm4 = vcmask 130048   ;;  %v591_v23 = vld [vmem:[#allocation2] sm:$0xff]  ;;  %v791_v24 = vld [vmem:[%s1534_s9 + $0x78] sm:$0xff] }
 0x12c   : > { %629 = vmatpush1.msra.mxu0 %v484_v2  ;;  %1312 = vmatprep.subr.mxu1 %v791_v24  ;;  %v790_v25 = vld [vmem:[%s1534_s9 + $0x70] sm:$0xff]  ;;  %v592_v26 = vld [vmem:[#allocation2 + $0x8] sm:$0xff]  ;;  %v788_v28 = vld [vmem:[%s1534_s9 + $0x60] sm:$0xff]  ;;  %s1465_s26 = smov 127   ;;  %s1467_s18 = smov 1  }
 0x12d   : > { %630 = vmatprep.subr.mxu0 %v570_v19  ;;  %1313 = vmatpush3.msra.mxu1 %v791_v24  ;;  %v789_v27 = vld [vmem:[%s1534_s9 + $0x68] sm:$0xff]  ;;  %v787_v29 = vld [vmem:[%s1534_s9 + $0x58] sm:$0xff]  ;;  %v786_v30 = vld [vmem:[%s1534_s9 + $0x50] sm:$0xff]  ;;  %s1102_s28 = scalar_select %p259_p3, 1, 0 }
 0x12e   : > { %631 = vmatpush1.msra.mxu0 %v478_v61  ;;  %1314 = vmatprep.subr.mxu1 %v790_v25  ;;  %v785_v31 = vld [vmem:[%s1534_s9 + $0x48] sm:$0xff]  ;;  %v783_v32 = vld [vmem:[%s1534_s9 + $0x38] sm:$0xff]  ;;  %v782_v33 = vld [vmem:[%s1534_s9 + $0x30] sm:$0xff] }
 0x12f   : > { %1219 = vmatprep.subr.msk.mxu0 %vm576_vm3, %v1464_v22  ;;  %1217 = vmatmul.mubr.msk.f32.vlgmr.msra.gmra.mxu0 %vm593_vm4, %v591_v23  ;;  %v781_v34 = vld [vmem:[%s1534_s9 + $0x28] sm:$0xff]  ;;  %v780_v35 = vld [vmem:[%s1534_s9 + $0x20] sm:$0xff]  ;;  %v779_v36 = vld [vmem:[%s1534_s9 + $0x18] sm:$0xff] }
 0x130   : > { %1220 = vmatpush1.msk.msra.mxu0 %vm574_vm2, %v1464_v22  ;;  %670 = vmatprep.mubr.f32.mxu0 %v1463_v6  ;;  %v778_v37 = vld [vmem:[%s1534_s9 + $0x10] sm:$0xff]  ;;  %v777_v38 = vld [vmem:[%s1534_s9 + $0x8] sm:$0xff]  ;;  %v776_v39 = vld [vmem:[%s1534_s9] sm:$0xff] }
 0x131   : > { %1221 = vmatprep.subr.msk.mxu0 %vm1649_vm1, %v1464_v22  ;;  %1315 = vmatpush3.msra.mxu1 %v790_v25  ;;  %v1686_v40 = vld [vmem:[%s1554_s22] sm:$0xff]  ;;  %s1468_s22 = smov 2  }
 0x132   : > { %1222 = vmatpush1.msk.msra.mxu0 %vm573_vm0, %v1464_v22  ;;  %1316 = vmatprep.subr.mxu1 %v789_v27  ;;  %v888_v41 = vrot.slane %v1686_v40, %v402_v57  ;;  %v898_v12 = vrot.slane %v1686_v40, %v406_v1  ;;  %v1225_v14 = vld [vmem:[%s275_s15] ss:$0 sm:$0xff]  ;;  %v878_v15 = vrot.slane %v1686_v40, %v398_v55  ;;  %s1466_s15 = smov 126  }
 0x133   : > { %1218 = vmatmul.mubr.msk.f32.gmra.mxu0 %vm593_vm4, %v592_v26  ;;  %1317 = vmatpush3.msra.mxu1 %v789_v27 }
 0x134   : > { %741 = vmatprep.mubr.f32.mxu0 %v1463_v6  ;;  %1318 = vmatprep.subr.mxu1 %v788_v28  ;;  %v900_v13 = vmul.f32 %v898_v12, %v1645_v8  ;;  %v899_v21 = vmul.f32 %v898_v12, %v1647_v10 }
 0x135   : > { %1319 = vmatpush3.msra.mxu1 %v788_v28 }
 0x136   : > { %1320 = vmatprep.subr.mxu1 %v787_v29 }
 0x137   : > { %1223 = vmatmul.mubr.msk.f32.vlgmr.msra.gmra.mxu0 %vm593_vm4, %v591_v23  ;;  %1321 = vmatpush3.msra.mxu1 %v787_v29 }
 0x138   : > { %747 = vmatprep.mubr.f32.mxu0 %v1463_v6  ;;  %1322 = vmatprep.subr.mxu1 %v786_v30  ;;  %v784_v6 = vld [vmem:[%s1534_s9 + $0x40] sm:$0xff] }
 0x139   : > { %1323 = vmatpush3.msra.mxu1 %v786_v30 }
 0x13a   : > { %1324 = vmatprep.subr.mxu1 %v785_v31 }
 0x13b   : > { %1224 = vmatmul.mubr.msk.f32.gmra.mxu0 %vm593_vm4, %v592_v26  ;;  %1325 = vmatpush3.msra.mxu1 %v785_v31 }
 0x13c   : > { %1326 = vmatprep.subr.mxu1 %v784_v6 }
 0x13d   : > { %1327 = vmatpush3.msra.mxu1 %v784_v6 }
 0x13e   : > { %1328 = vmatprep.subr.mxu1 %v783_v32 }
 0x13f   : > { %1329 = vmatpush3.msra.mxu1 %v783_v32 }
 0x140   : > { %1330 = vmatprep.subr.mxu1 %v782_v33 }
 0x141   : > { %1331 = vmatpush3.msra.mxu1 %v782_v33 }
 0x142   : > { %1332 = vmatprep.subr.mxu1 %v781_v34 }
 0x143   : > { %1333 = vmatpush3.msra.mxu1 %v781_v34 }
 0x144   : > { %1334 = vmatprep.subr.mxu1 %v780_v35 }
 0x145   : > { %1335 = vmatpush3.msra.mxu1 %v780_v35 }
 0x146   : > { %1336 = vmatprep.subr.mxu1 %v779_v36 }
 0x147   : > { %1337 = vmatpush3.msra.mxu1 %v779_v36 }
 0x148   : > { %1338 = vmatprep.subr.mxu1 %v778_v37 }
 0x149   : > { %1339 = vmatpush3.msra.mxu1 %v778_v37 }
 0x14a   : > { %1340 = vmatprep.subr.mxu1 %v777_v38 }
 0x14b   : > { %1341 = vmatpush3.msra.mxu1 %v777_v38 }
 0x14c   : > { %1342 = vmatprep.subr.mxu1 %v776_v39 }
 0x14d   : > { %1343 = vmatpush3.msra.mxu1 %v776_v39 }
 0x1ef   : > { %v1691_v42 = vpop.f32.mrf.mxu0 }
 0x1f0   : > { %v889_v43 = vmul.f32 %v888_v41, %v1691_v42 }
 0x1f1   : > { %v668_v44 = vpop.f32.mrf.mxu0 }
 0x1f2   : > { %v768_v45 = vmul.f32 1.442695, %v668_v44  ;;  %891 = vadd.xlane.f32.xlu1 %v889_v43 }
 0x1f3   : > { %v1694_v46 = vpop.f32.mrf.mxu0 }
 0x1f4   : > { %v890_v47 = vmul.f32 %v888_v41, %v1694_v46  ;;  %1384 = vpow2.f32 %v768_v45  ;;  %v943_v45 = vsub.s32 3, %v1633_v54 }
 0x1f5   : > { %v674_v48 = vpop.f32.mrf.mxu0 }
 0x1f6   : > { %v770_v49 = vmul.f32 1.442695, %v674_v48  ;;  %893 = vadd.xlane.f32.xlu1 %v890_v47  ;;  %v957_v47 = vsub.s32 5, %v1633_v54 }
 0x1f7   : > { %v743_v50 = vpop.f32.mrf.mxu0 }
 0x1f8   : > { %v754_v51 = vmul.f32 0.5, %v743_v50  ;;  %1386 = vpow2.f32 %v770_v49  ;;  %v949_v49 = vsub.s32 4, %v1633_v54 }
 0x1f9   : > { %v745_v52 = vpop.f32.mrf.mxu0 }
 0x1fa   : > { %v756_v53 = vfloor.f32 %v754_v51  ;;  %vm766_vm5 = vcmp.gt.f32.partialorder %v745_v52, 0.5  ;;  %903 = vadd.xlane.f32.xlu1 %v900_v13  ;;  %v944_v51 = vrot.slane %v1686_v40, %v943_v45  ;;  %v958_v52 = vrot.slane %v1686_v40, %v957_v47 }
 0x1fb   : > { %v749_v56 = vpop.f32.mrf.mxu0  ;;  %vm1226_vm6 = vmneg %vm766_vm5 }
 0x1fc   : > { %v758_v57 = vmul.f32 2.0, %v756_v53  ;;  %v755_v58 = vmul.f32 0.5, %v749_v56 }
 0x1fd   : > { %v751_v3 = vpop.f32.mrf.mxu0 }
 0x1fe   : > { %v760_v59 = vsub.f32 %v743_v50, %v758_v57  ;;  %v757_v60 = vfloor.f32 %v755_v58  ;;  %vm767_vm7 = vcmp.gt.f32.partialorder %v751_v3, 0.5 }
 0x1ff   : > { %vm1228_vm8 = vmneg %vm767_vm7 }
 0x200   : > { %v762_v61 = vmul.f32 2.0, %v760_v59  ;;  %v759_v62 = vmul.f32 2.0, %v757_v60 }
 0x201   : > { %v1385_v2 = vpop.eup %1384 }
 0x202   : > { %v764_v63 = vsub.f32 1.0, %v762_v61  ;;  %v761_v0 = vsub.f32 %v749_v56, %v759_v62  ;;  %v950_v56 = vrot.slane %v1686_v40, %v949_v49 }
 0x204   : > { %v763_v4 = vmul.f32 2.0, %v761_v0  ;;  %v772_v5 = vmul.f32 %v1385_v2, %v764_v63 }
 0x205   : > { %v1387_v9 = vpop.eup %1386 }
 0x206   : > { %v765_v7 = vsub.f32 1.0, %v763_v4  ;;  %1344 = vmatprep.mubr.msk.f32.mxu1 %vm1226_vm6, %v772_v5 }
 0x208   : > { %v773_v11 = vmul.f32 %v1387_v9, %v765_v7 }
 0x20a   : > { %1345 = vmatmul.mubr.msk.f32.vlgmr.msra.gmra.mxu1 %vm1228_vm8, %v773_v11 }
 0x27b   : > { %v892_v22 = vpop.xlane.xlu1 %891 }
 0x27c   : > { %v1232_v26 = vmul.f32 -1.442695, %v892_v22 }
 0x27f   : > { %v894_v23 = vpop.xlane.xlu1 %893 }
 0x280   : > { %v1233_v25 = vmul.f32 -1.442695, %v894_v23 }
 0x282   : > { %1388 = vpow2.f32 %v1233_v25 }
 0x283   : > { %v904_v24 = vpop.xlane.xlu1 %903 }
 0x284   : > { %v1235_v55 = vmul.f32 -1.442695, %v904_v24 }
 0x286   : > { %1390 = vpow2.f32 %v1235_v55 }
 0x287   : > { %1392 = vpow2.f32 %v1232_v26 }
 0x28f   : > { %v1389_v6 = vpop.eup %1388 }
 0x290   : > { %v924_v34 = vadd.f32 1.0, %v1389_v6 }
 0x293   : > { %v1391_v33 = vpop.eup %1390 }
 0x294   : > { %v936_v35 = vadd.f32 1.0, %v1391_v33  ;;  %v1393_v36 = vpop.eup %1392 }
 0x295   : > { %v923_v39 = vadd.f32 1.0, %v1393_v36 }
 0x2ca   : > { %v1346_v16 = vpop.f32.mrf.mxu1 }
 0x2cb   : > { %v1709_v17 = vadd.f32 %v1346_v16, %v1225_v14 }
 0x2cc   : > { %v865_v18 = vpop.f32.mrf.mxu1 }
 0x2cd   : > { %v1711_v19 = vadd.f32 %v1225_v14, %v865_v18  ;;  %v880_v1 = vmul.f32 %v878_v15, %v1709_v17 }
 0x2cf   : > { %883 = vadd.xlane.f32.xlu0 %v880_v1  ;;  %v879_v20 = vmul.f32 %v878_v15, %v1711_v19 }
 0x2d3   : > { %881 = vadd.xlane.f32.xlu0 %v879_v20 }
 0x2d7   : > { %901 = vadd.xlane.f32.xlu0 %v899_v21 }
 0x358   : > { %v884_v27 = vpop.xlane.xlu0 %883 }
 0x359   : > { %v1231_v28 = vmul.f32 -1.442695, %v884_v27 }
 0x35b   : > { %1394 = vpow2.f32 %v1231_v28 }
 0x35c   : > { %v882_v29 = vpop.xlane.xlu0 %881 }
 0x35d   : > { %v1230_v30 = vmul.f32 -1.442695, %v882_v29 }
 0x35f   : > { %1396 = vpow2.f32 %v1230_v30 }
 0x360   : > { %v902_v31 = vpop.xlane.xlu0 %901 }
 0x361   : > { %v1234_v32 = vmul.f32 -1.442695, %v902_v31 }
 0x363   : > { %1398 = vpow2.f32 %v1234_v32 }
 0x364   : > { %1400 = vrcp.f32 %v924_v34  ;;  %v1469_v34 = vmov 0  }
 0x365   : > { %1402 = vrcp.f32 %v936_v35  ;;  %1379 = vset.pattern.permute.xlu0 %v1469_v34  ;;  %1378 = vset.pattern.permute.xlu1 %v1469_v34 }
 0x368   : > { %v1395_v37 = vpop.eup %1394 }
 0x369   : > { %v912_v38 = vadd.f32 1.0, %v1395_v37 }
 0x36b   : > { %1404 = vrcp.f32 %v912_v38 }
 0x36c   : > { %v1397_v41 = vpop.eup %1396  ;;  %1406 = vrcp.f32 %v923_v39 }
 0x36d   : > { %v911_v43 = vadd.f32 1.0, %v1397_v41 }
 0x36f   : > { %1408 = vrcp.f32 %v911_v43 }
 0x370   : > { %v1399_v44 = vpop.eup %1398 }
 0x371   : > { %v935_v48 = vadd.f32 1.0, %v1399_v44  ;;  %v1401_v50 = vpop.eup %1400 }
 0x372   : > { %v1403_v53 = vpop.eup %1402  ;;  %v952_v58 = vmul.f32 %v1401_v50, %v950_v56 }
 0x373   : > { %1410 = vrcp.f32 %v935_v48  ;;  %v960_v60 = vmul.f32 %v1403_v53, %v958_v52 }
 0x378   : > { %v1405_v57 = vpop.eup %1404 }
 0x379   : > { %v946_v59 = vmul.f32 %v1405_v57, %v944_v51  ;;  %v1407_v61 = vpop.eup %1406 }
 0x37a   : > { %v951_v3 = vmul.f32 %v1407_v61, %v950_v56 }
 0x37b   : > { %v954_v62 = vadd.f32 %v952_v58, %v946_v59  ;;  %v1470_v58 = vmov 1  }
 0x37c   : > { %v1409_v63 = vpop.eup %1408 }
 0x37d   : > { %v945_v0 = vmul.f32 %v1409_v63, %v944_v51  ;;  %v962_v2 = vadd.f32 %v960_v60, %v954_v62 }
 0x37f   : > { %v964_v54 = vmul.f32 0.33333334, %v962_v2  ;;  %v953_v7 = vadd.f32 %v951_v3, %v945_v0  ;;  %v1471_v3 = vmov 2  }
 0x380   : > { %v1411_v4 = vpop.eup %1410 }
 0x381   : > { %v959_v5 = vmul.f32 %v1411_v4, %v958_v52  ;;  %969 = vrot.lane.b32.xlu1 %v964_v54, %s1465_s26 }
 0x383   : > { %v961_v9 = vadd.f32 %v959_v5, %v953_v7 }
 0x385   : > { %v963_v11 = vmul.f32 0.33333334, %v961_v9 }
 0x387   : > { %975 = vrot.lane.b32.xlu1 %v963_v11, %s1466_s15  ;;  %967 = vrot.lane.b32.xlu0 %v963_v11, %s1465_s26 }
 0x38b   : > { %977 = vrot.lane.b32.xlu1 %v964_v54, %s1466_s15 }
 0x3f3   : > { %v970_v40 = vpop.permute.xlu1 %969 }
 0x3f4   : > { %v974_v15 = vmax.f32 %v964_v54, %v970_v40 }
 0x3f9   : > { %v976_v12 = vpop.permute.xlu1 %975  ;;  %v968_v13 = vpop.permute.xlu0 %967 }
 0x3fa   : > { %v973_v14 = vmax.f32 %v963_v11, %v968_v13 }
 0x3fc   : > { %v981_v16 = vmax.f32 %v973_v14, %v976_v12 }
 0x3fd   : > { %v978_v18 = vpop.permute.xlu1 %977 }
 0x3fe   : > { %v982_v1 = vmax.f32 %v974_v15, %v978_v18  ;;  %991 = vrot.lane.b32.xlu0 %v981_v16, %s1467_s18  ;;  %v983_v35 = vsub.f32 %v963_v11, %v981_v16  ;;  %v1103_v15 = vstv %s1102_s28 }
 0x3ff   : > { %vm1104_vm9 = vcmp.eq.s32.totalorder %v1103_v15, 1 }
 0x400   : > { %993 = vrot.lane.b32.xlu1 %v982_v1, %s1467_s18  ;;  %v984_v36 = vsub.f32 %v964_v54, %v982_v1  ;;  %v985_v37 = vmul.f32 1.442695, %v983_v35 }
 0x402   : > { %1003 = vrot.lane.b32.xlu0 %v981_v16, %s1468_s22  ;;  %v987_v38 = vmul.f32 1.442695, %v984_v36 }
 0x404   : > { %1005 = vrot.lane.b32.xlu1 %v982_v1, %s1468_s22 }
 0x470   : > { %v992_v20 = vpop.permute.xlu0 %991 }
 0x471   : > { %v997_v21 = vsub.f32 %v963_v11, %v992_v20 }
 0x472   : > { %v994_v22 = vpop.permute.xlu1 %993 }
 0x473   : > { %v999_v23 = vmul.f32 1.442695, %v997_v21  ;;  %v998_v24 = vsub.f32 %v964_v54, %v994_v22 }
 0x474   : > { %v1004_v25 = vpop.permute.xlu0 %1003 }
 0x475   : > { %1412 = vpow2.f32 %v999_v23  ;;  %v1001_v55 = vmul.f32 1.442695, %v998_v24  ;;  %v1009_v26 = vsub.f32 %v963_v11, %v1004_v25 }
 0x476   : > { %v1006_v27 = vpop.permute.xlu1 %1005 }
 0x477   : > { %1414 = vpow2.f32 %v1001_v55  ;;  %v1011_v28 = vmul.f32 1.442695, %v1009_v26  ;;  %v1010_v29 = vsub.f32 %v964_v54, %v1006_v27 }
 0x479   : > { %1416 = vpow2.f32 %v1011_v28  ;;  %v1013_v30 = vmul.f32 1.442695, %v1010_v29 }
 0x47b   : > { %1418 = vpow2.f32 %v1013_v30 }
 0x47c   : > { %1420 = vpow2.f32 %v985_v37 }
 0x47d   : > { %1422 = vpow2.f32 %v987_v38 }
 0x482   : > { %v1413_v31 = vpop.eup %1412 }
 0x483   : > { %1017 = vrot.lane.b32.xlu0 %v1413_v31, %s1465_s26 }
 0x484   : > { %v1415_v6 = vpop.eup %1414 }
 0x485   : > { %1019 = vrot.lane.b32.xlu1 %v1415_v6, %s1465_s26 }
 0x486   : > { %v1417_v32 = vpop.eup %1416 }
 0x487   : > { %1027 = vrot.lane.b32.xlu0 %v1417_v32, %s1466_s15 }
 0x488   : > { %v1419_v33 = vpop.eup %1418 }
 0x489   : > { %1029 = vrot.lane.b32.xlu1 %v1419_v33, %s1466_s15  ;;  %v1421_v41 = vpop.eup %1420 }
 0x48a   : > { %v1423_v45 = vpop.eup %1422 }
 0x4f5   : > { %v1018_v39 = vpop.permute.xlu0 %1017 }
 0x4f6   : > { %v1023_v44 = vadd.f32 %v1421_v41, %v1018_v39 }
 0x4f7   : > { %v1020_v43 = vpop.permute.xlu1 %1019 }
 0x4f8   : > { %v1024_v48 = vadd.f32 %v1423_v45, %v1020_v43 }
 0x4f9   : > { %v1028_v47 = vpop.permute.xlu0 %1027 }
 0x4fa   : > { %v1033_v49 = vadd.f32 %v1028_v47, %v1023_v44 }
 0x4fb   : > { %v1030_v50 = vpop.permute.xlu1 %1029 }
 0x4fc   : > { %1424 = vrcp.f32 %v1033_v49  ;;  %v1034_v51 = vadd.f32 %v1030_v50, %v1024_v48 }
 0x4fe   : > { %1426 = vrcp.f32 %v1034_v51 }
 0x509   : > { %v1425_v52 = vpop.eup %1424 }
 0x50a   : > { %1055 = vrot.lane.b32.xlu0 %v1425_v52, %s1467_s18  ;;  %v1039_v56 = vmul.f32 %v1425_v52, %v1421_v41 }
 0x50b   : > { %v1427_v53 = vpop.eup %1426 }
 0x50c   : > { %1057 = vrot.lane.b32.xlu1 %v1427_v53, %s1467_s18  ;;  %v1040_v57 = vmul.f32 %v1427_v53, %v1423_v45 }
 0x50e   : > { %1077 = vrot.lane.b32.xlu0 %v1425_v52, %s1468_s22 }
 0x510   : > { %1079 = vrot.lane.b32.xlu1 %v1427_v53, %s1468_s22 }
 0x512   : > { %1043 = vperm.xlu0 %1379, %v1039_v56  }
 0x514   : > { %1048 = vperm.xlu1 %1378, %v1040_v57  }
 0x516   : > { %1381 = vset.pattern.permute.xlu0 %v1470_v58 }
 0x518   : > { %1380 = vset.pattern.permute.xlu1 %v1470_v58 }
 0x57c   : > { %v1056_v59 = vpop.permute.xlu0 %1055 }
 0x57d   : > { %v1061_v60 = vmul.f32 %v1413_v31, %v1056_v59 }
 0x57e   : > { %v1058_v61 = vpop.permute.xlu1 %1057 }
 0x57f   : > { %v1062_v62 = vmul.f32 %v1415_v6, %v1058_v61  ;;  %1065 = vperm.xlu1 %1380, %v1061_v60  }
 0x580   : > { %v1078_v63 = vpop.permute.xlu0 %1077 }
 0x581   : > { %v1083_v0 = vmul.f32 %v1417_v32, %v1078_v63  ;;  %1070 = vperm.xlu0 %1381, %v1062_v62  }
 0x582   : > { %v1080_v2 = vpop.permute.xlu1 %1079 }
 0x583   : > { %1382 = vset.pattern.permute.xlu1 %v1471_v3  ;;  %v1084_v54 = vmul.f32 %v1419_v33, %v1080_v2 }
 0x584   : > { %1087 = vperm.xlu1 %1382, %v1083_v0  }
 0x585   : > { %1383 = vset.pattern.permute.xlu0 %v1471_v3 }
 0x588   : > { %1092 = vperm.xlu1 %1382, %v1084_v54  }
 0x58d   : > { %v1044_v5 = vpop.permute.xlu0 %1043 }
 0x58e   : > { %v1051_v40 = vmul.f32 %v1044_v5, %v1711_v19 }
 0x58f   : > { %v1049_v4 = vpop.permute.xlu1 %1048 }
 0x590   : > { %v1052_v18 = vmul.f32 %v1049_v4, %v1709_v17 }
 0x5fa   : > { %v1066_v7 = vpop.permute.xlu1 %1065 }
 0x5fb   : > { %v1073_v9 = vmul.f32 %v1066_v7, %v1691_v42 }
 0x5fc   : > { %v1071_v11 = vpop.permute.xlu0 %1070 }
 0x5fd   : > { %v1075_v13 = vadd.f32 %v1073_v9, %v1051_v40  ;;  %v1074_v14 = vmul.f32 %v1071_v11, %v1694_v46 }
 0x5ff   : > { %v1088_v12 = vpop.permute.xlu1 %1087  ;;  %v1076_v21 = vadd.f32 %v1074_v14, %v1052_v18 }
 0x600   : > { %v1095_v16 = vmul.f32 %v1088_v12, %v1647_v10 }
 0x602   : > { %v1097_v1 = vadd.f32 %v1095_v16, %v1075_v13 }
 0x603   : > { %v1093_v20 = vpop.permute.xlu1 %1092 }
 0x604   : > { %v1100_v22 = vmax.f32 %v1097_v1, 0.0  ;;  %v1096_v42 = vmul.f32 %v1093_v20, %v1645_v8 }
 0x606   : > { %v1105_v23 = vsel %vm1104_vm9, %v1100_v22, %v1097_v1  ;;  %v1098_v24 = vadd.f32 %v1096_v42, %v1076_v21 }
 0x607   : > { %1107 = vst [vmem:[%s1762_s7] sm:$0xff] %v1105_v23 }
 0x608   : > { %v1101_v19 = vmax.f32 %v1098_v24, 0.0 }
 0x60a   : > { %v1106_v46 = vsel %vm1104_vm9, %v1101_v19, %v1098_v24 }
 0x60b   : > { %1108 = vst [vmem:[%s1762_s7 + $0x8] sm:$0xff] %v1106_v46 }
 0x60c PF: > { %s17_s24 = sadd.s32 1, %s1460_s24  }
 0x60d   : > { %p14_p11 = scmp.ge.s32.totalorder %s17_s24, 5  }
 0x60f   :  { %16 = sbr.rel (!%p14_p11) target bundleno = 1 (0x1), region = 134 }
 0x614   :  { %1120 = vsyncmov [#allocation3] }
 0x617   :  { %s1121_s10 = vpop.sfrf %1120 }
 0x618   :  { %p1238_p12 = scmp.ne.s32.totalorder %s1121_s10, 0 }
 0x61a   :  { %1125 = shalt.err (%p1238_p12)  }
 0x61b   :  { %1127 = vsyncmov [#allocation3 + $0x1] }
 0x61e   :  { %s1128_s11 = vpop.sfrf %1127 }
 0x61f   :  { %p1239_p13 = scmp.ne.s32.totalorder %s1128_s11, 0 }
 0x621   :  { %1132 = shalt.err (%p1239_p13)  }

</bundles_post_ra>
